<compile_context>
chip_gen: v5e
topology: v5e:2x2
jax: 0.10.0
libtpu: 0.0.40
codegen_flags: <defaults>
</compile_context>

<pallas_src>
import jax
import jax.numpy as jnp
from jax.experimental import pallas as pl
from jax.experimental.pallas import tpu as pltpu

D = 768          # hidden dim (fixed by the module)
EPS = 1e-6       # matches nn.LayerNorm((768,), eps=1e-06)
LANE = 128       # TPU lane width


def _round_up(n, m):
    return ((n + m - 1) // m) * m


def mlp_cls_kernel(x_ref, w_ref, c_ref, b_ref, o_ref):
    # x_ref: (TM, D); w_ref: (D, Cp) folded weights, column 0 = ones;
    # c_ref/b_ref: (1, Cp); o_ref: (TM, Cp) with Cp a multiple of 128.
    x = x_ref[...].astype(jnp.float32)          # no-op for f32 inputs

    # Single full-width MXU pass over the tile.  Column 0 of w_ref is all
    # ones, so z[:, 0] == rowsum(x): the LayerNorm mean is free.
    z = jnp.dot(x, w_ref[...], preferred_element_type=jnp.float32)   # (TM, Cp)

    inv_d = jnp.float32(1.0 / D)
    mean = z[:, 0:1] * inv_d                                          # (TM, 1)

    # E[x^2] via one small MXU matmul (keeps the XLU idle).  A single
    # default-precision pass is plenty once it goes through rsqrt.
    ones = jnp.ones((D, 1), jnp.float32)
    ex2 = jnp.dot(x * x, ones, preferred_element_type=jnp.float32) * inv_d
    # TODO(synk): one-pass E[x^2]-mean^2 loses precision when |mean| >> std;
    # fine for typical transformer activations (same caveat as most fused LNs).
    var = jnp.maximum(ex2 - mean * mean, 0.0)
    inv = jax.lax.rsqrt(var + jnp.float32(EPS))                       # EUP

    # Folded LayerNorm + Linear.  Scale/shift happen on the narrow (Cp-wide)
    # output instead of the 768-wide stream; padded columns (incl. the ones
    # column, since c[0] == D) come out ~0 and are sliced off by the wrapper.
    o_ref[...] = (inv * (z - mean * c_ref[...]) + b_ref[...]).astype(o_ref.dtype)


def prepare_mlp_cls_params(gamma, beta, w, b):
    """One-time fold of LayerNorm(gamma, beta) into the classifier (w, b).

    w is (768, C) = fc.weight.T, b is (C,).  Returns (w_aug, c, b_fold, C):
      w_aug : (768, Cp) f32, column 0 = ones (rowsum helper), columns 1..C =
              diag(gamma) @ w, remaining columns zero; Cp = round_up(C+1, 128).
      c     : (1, Cp) column sums of w_aug  (c[0] == 768).
      b_fold: (1, Cp), columns 1..C = beta @ w + b, rest zero.
    Call once at init and reuse for every forward (keeps weight padding, f32
    casts and the gamma/beta fold off the per-call path).
    """
    C = int(w.shape[1])
    assert w.shape[0] == D and gamma.shape[-1] == D and beta.shape[-1] == D
    Cp = _round_up(C + 1, LANE)
    w_f = w.astype(jnp.float32)
    g = gamma.reshape(D).astype(jnp.float32)
    be = beta.reshape(D).astype(jnp.float32)

    w_fold = w_f * g[:, None]                          # diag(gamma) @ W
    w_aug = jnp.zeros((D, Cp), jnp.float32)
    w_aug = w_aug.at[:, 0].set(1.0)                    # rowsum(x) helper column
    w_aug = w_aug.at[:, 1:C + 1].set(w_fold)
    c = jnp.sum(w_aug, axis=0, keepdims=True)          # (1, Cp)
    b_fold = jnp.zeros((1, Cp), jnp.float32)
    b_fold = b_fold.at[0, 1:C + 1].set(be @ w_f + b.astype(jnp.float32))
    return (w_aug, c, b_fold, C)


def mlp_cls_apply(x, params, *, tile_m=1024, slice_output=True):
    """Fused LayerNorm(768, eps=1e-6) + Linear using prepared params.

    x: (..., 768); returns (..., C) in x.dtype.  With slice_output=False the
    lane-padded (..., Cp) slab is returned (classes live in columns 1..C,
    other columns ~0) so a downstream consumer can slice lazily and skip one
    extra HBM pass over the output.
    """
    w_aug, c, b_fold, C = params
    Cp = w_aug.shape[1]
    orig_shape = x.shape
    assert orig_shape[-1] == D, f"last dim must be {D}"
    x2 = x.reshape(-1, D)
    N = x2.shape[0]

    # Row tile: tile_m for large N (plenty of steps anyway); otherwise aim for
    # ~4 grid steps so DMA/compute overlap and v7x megacore still kick in,
    # with an 8-row (sublane) floor.  No row padding: grid = cdiv and Pallas
    # masks the ragged last block.  (On v5e with huge N, sweep tile_m -> 2048.)
    if N >= 4 * tile_m:
        tm = tile_m
    else:
        tm = max(8, min(tile_m, _round_up(pl.cdiv(N, 4), 8)))
    grid = (pl.cdiv(N, tm),)

    out = pl.pallas_call(
        mlp_cls_kernel,
        out_shape=jax.ShapeDtypeStruct((N, Cp), x.dtype),
        grid=grid,
        in_specs=[
            pl.BlockSpec((tm, D), lambda i: (i, 0)),     # x tile (streamed)
            pl.BlockSpec((D, Cp), lambda i: (0, 0)),     # folded W (resident)
            pl.BlockSpec((1, Cp), lambda i: (0, 0)),     # column sums c
            pl.BlockSpec((1, Cp), lambda i: (0, 0)),     # folded bias
        ],
        out_specs=pl.BlockSpec((tm, Cp), lambda i: (i, 0)),
        compiler_params=pltpu.CompilerParams(
            dimension_semantics=("parallel",),
            # ~8 MiB of pipeline buffers + a few (TM,768)/(TM,Cp) temporaries
            # at tm=1024; 32 MiB leaves headroom on v5e and fits v7x's 64 MiB.
            vmem_limit_bytes=32 * 1024 * 1024,
        ),
    )(x2, w_aug, c, b_fold)

    if slice_output:
        return out[:, 1:C + 1].reshape(orig_shape[:-1] + (C,))
    return out.reshape(orig_shape[:-1] + (Cp,))


def mlp_cls_classes(x, gamma, beta, w, b, *, tile_m=1024):
    """Convenience one-shot wrapper (prefer prepare_mlp_cls_params + apply)."""
    return mlp_cls_apply(x, prepare_mlp_cls_params(gamma, beta, w, b),
                         tile_m=tile_m)


if __name__ == "__main__":
    num_classes = 10
    B, S = 2, 8   # 16 token rows, exercises leading-dim flattening

    key = jax.random.PRNGKey(0)
    kx, kg, kb, kw, kbias = jax.random.split(key, 5)

    x = jax.random.normal(kx, (B, S, D), dtype=jnp.float32)
    # LayerNorm affine params (PyTorch init gamma=1, beta=0; perturbed so the
    # affine fold is actually exercised).
    gamma = 1.0 + 0.01 * jax.random.normal(kg, (D,), dtype=jnp.float32)
    beta = 0.01 * jax.random.normal(kb, (D,), dtype=jnp.float32)
    # Linear params stored as (in_features, out_features) = fc.weight.T
    w = 0.02 * jax.random.normal(kw, (D, num_classes), dtype=jnp.float32)
    b = 0.02 * jax.random.normal(kbias, (num_classes,), dtype=jnp.float32)

    params = prepare_mlp_cls_params(gamma, beta, w, b)   # once, at "init"
    out = mlp_cls_apply(x, params)
    jax.block_until_ready(out)

    # Pure-JAX reference (exact-math LayerNorm + Linear).
    mean = jnp.mean(x, axis=-1, keepdims=True)
    var = jnp.mean((x - mean) ** 2, axis=-1, keepdims=True)
    xn = (x - mean) / jnp.sqrt(var + EPS) * gamma + beta
    ref = xn @ w + b

    assert out.shape == (B, S, num_classes)
    # Default-precision MXU (bf16 multiplies) on the logits head gives ~1e-3
    # absolute error vs an exact-f32 reference; acceptable for a classifier.
    assert jnp.allclose(out, ref, atol=2e-2), float(jnp.max(jnp.abs(out - ref)))

    print("KERNEL_OK")
</pallas_src>

<mosaic_0001>
module attributes {stable_mosaic.version = 11 : i64} {
  func.func @mlp_cls_kernel(%arg0: i32, %arg1: memref<8x768xf32, #tpu.memory_space<vmem>>, %arg2: memref<768x128xf32, #tpu.memory_space<vmem>>, %arg3: memref<1x128xf32, #tpu.memory_space<vmem>>, %arg4: memref<1x128xf32, #tpu.memory_space<vmem>>, %arg5: memref<8x128xf32, #tpu.memory_space<vmem>>) attributes {dimension_semantics = [#tpu.dimension_semantics<parallel>], iteration_bounds = array<i64: 2>, scalar_prefetch = 0 : i64, scratch_operands = 0 : i64, tpu.core_type = #tpu.core_type<tc>, window_params = [{transform_indices = @transform_0, window_bounds = array<i64: 8, 768>}, {pipeline_mode = #tpu.pipeline_mode<synchronous>, transform_indices = @transform_1, window_bounds = array<i64: 768, 128>}, {pipeline_mode = #tpu.pipeline_mode<synchronous>, transform_indices = @transform_2, window_bounds = array<i64: 1, 128>}, {pipeline_mode = #tpu.pipeline_mode<synchronous>, transform_indices = @transform_3, window_bounds = array<i64: 1, 128>}, {transform_indices = @transform_4, window_bounds = array<i64: 8, 128>}]} {
    %c0 = arith.constant 0 : index
    %c0_0 = arith.constant 0 : index
    %0 = vector.load %arg1[%c0, %c0_0] : memref<8x768xf32, #tpu.memory_space<vmem>>, vector<8x768xf32>
    %c0_1 = arith.constant 0 : index
    %c0_2 = arith.constant 0 : index
    %1 = vector.load %arg2[%c0_1, %c0_2] : memref<768x128xf32, #tpu.memory_space<vmem>>, vector<768x128xf32>
    %cst = arith.constant dense<0.000000e+00> : vector<8x128xf32>
    %2 = tpu.matmul %0, %1, %cst {dimension_numbers = #tpu.dot_dimension_numbers<[1], [0], [0], [1], [0, 0, 1, 1], [], []>} : vector<8x768xf32>, vector<768x128xf32>, vector<8x128xf32> -> vector<8x128xf32>
    %3 = vector.extract_strided_slice %2 {offsets = [0, 0], sizes = [8, 1], strides = [1, 1]} : vector<8x128xf32> to vector<8x1xf32>
    %cst_3 = arith.constant 0.00130208337 : f32
    %4 = vector.broadcast %cst_3 : f32 to vector<8x1xf32>
    %5 = arith.mulf %3, %4 : vector<8x1xf32>
    %cst_4 = arith.constant 1.000000e+00 : f32
    %6 = vector.broadcast %cst_4 : f32 to vector<768x1xf32>
    %7 = arith.mulf %0, %0 : vector<8x768xf32>
    %cst_5 = arith.constant dense<0.000000e+00> : vector<8x1xf32>
    %8 = tpu.matmul %7, %6, %cst_5 {dimension_numbers = #tpu.dot_dimension_numbers<[1], [0], [0], [1], [0, 0, 1, 1], [], []>} : vector<8x768xf32>, vector<768x1xf32>, vector<8x1xf32> -> vector<8x1xf32>
    %cst_6 = arith.constant 0.00130208337 : f32
    %9 = vector.broadcast %cst_6 : f32 to vector<8x1xf32>
    %10 = arith.mulf %8, %9 : vector<8x1xf32>
    %11 = arith.mulf %5, %5 : vector<8x1xf32>
    %12 = arith.subf %10, %11 : vector<8x1xf32>
    %cst_7 = arith.constant 0.000000e+00 : f32
    %13 = vector.broadcast %cst_7 : f32 to vector<8x1xf32>
    %14 = arith.maximumf %12, %13 : vector<8x1xf32>
    %cst_8 = arith.constant 9.99999997E-7 : f32
    %15 = vector.broadcast %cst_8 : f32 to vector<8x1xf32>
    %16 = arith.addf %14, %15 : vector<8x1xf32>
    %17 = math.rsqrt %16 : vector<8x1xf32>
    %c0_9 = arith.constant 0 : index
    %c0_10 = arith.constant 0 : index
    %18 = vector.load %arg3[%c0_9, %c0_10] : memref<1x128xf32, #tpu.memory_space<vmem>>, vector<1x128xf32>
    %19 = vector.broadcast %5 : vector<8x1xf32> to vector<8x128xf32>
    %20 = vector.broadcast %18 : vector<1x128xf32> to vector<8x128xf32>
    %21 = arith.mulf %19, %20 : vector<8x128xf32>
    %22 = arith.subf %2, %21 : vector<8x128xf32>
    %23 = vector.broadcast %17 : vector<8x1xf32> to vector<8x128xf32>
    %24 = arith.mulf %23, %22 : vector<8x128xf32>
    %c0_11 = arith.constant 0 : index
    %c0_12 = arith.constant 0 : index
    %25 = vector.load %arg4[%c0_11, %c0_12] : memref<1x128xf32, #tpu.memory_space<vmem>>, vector<1x128xf32>
    %26 = vector.broadcast %25 : vector<1x128xf32> to vector<8x128xf32>
    %27 = arith.addf %24, %26 : vector<8x128xf32>
    %c0_13 = arith.constant 0 : index
    %c0_14 = arith.constant 0 : index
    %28 = vector.load %arg5[%c0_13, %c0_14] : memref<8x128xf32, #tpu.memory_space<vmem>>, vector<8x128xf32>
    tpu.vector_store %arg5[%c0_13, %c0_14], %27 {strides = array<i32>} : memref<8x128xf32, #tpu.memory_space<vmem>>, vector<8x128xf32>,
    return
  }
  func.func @transform_0(%arg0: i32) -> (i32, i32) {
    %c0_i32 = arith.constant 0 : i32
    %c0_i32_0 = arith.constant 0 : i32
    return %arg0, %c0_i32 : i32, i32
  }
  func.func @transform_1(%arg0: i32) -> (i32, i32) {
    %c0_i32 = arith.constant 0 : i32
    %c0_i32_0 = arith.constant 0 : i32
    %c0_i32_1 = arith.constant 0 : i32
    return %c0_i32, %c0_i32_0 : i32, i32
  }
  func.func @transform_2(%arg0: i32) -> (i32, i32) {
    %c0_i32 = arith.constant 0 : i32
    %c0_i32_0 = arith.constant 0 : i32
    %c0_i32_1 = arith.constant 0 : i32
    return %c0_i32, %c0_i32_0 : i32, i32
  }
  func.func @transform_3(%arg0: i32) -> (i32, i32) {
    %c0_i32 = arith.constant 0 : i32
    %c0_i32_0 = arith.constant 0 : i32
    %c0_i32_1 = arith.constant 0 : i32
    return %c0_i32, %c0_i32_0 : i32, i32
  }
  func.func @transform_4(%arg0: i32) -> (i32, i32) {
    %c0_i32 = arith.constant 0 : i32
    %c0_i32_0 = arith.constant 0 : i32
    return %arg0, %c0_i32 : i32, i32
  }
}

</mosaic_0001>

<bundles_post_ra>
// kernel: tpu_custom_call.1
= control target key start
LH: loop header
LB: loop body
LE: loop exit
PB: predicated region body
PF: predicated region fallthrough
CT: control target
= control target key end

     0   :  { %s1236_s0 = inlined_call_operand.hbm [shape: f32[16,768], index: 0, kind: input, shape index: {}]   ;;  %s1237_s1 = inlined_call_operand.hbm [shape: f32[768,128], index: 1, kind: input, shape index: {}]   ;;  %s1238_s2 = inlined_call_operand.vmem [shape: f32[1,128], index: 2, kind: input, shape index: {}]   ;;  %s1239_s3 = inlined_call_operand.vmem [shape: f32[1,128], index: 3, kind: input, shape index: {}]   ;;  %s1240_s4 = inlined_call_operand.hbm [shape: f32[16,128], index: 4, kind: output, shape index: {}]  }
   0x1   :  { %1241 = sst [smem:[#allocation11_spill]] %s1237_s1 }
   0x2   :  { %9 = vsyncpa [#allocation3], 0 }
   0x3   :  { %11 = vsyncpa [#allocation3 + $0x1], 0 }
   0x4   :  { %12 = vsyncpa [#allocation6], 0 }
   0x5   :  { %13 = vsyncpa [#allocation4], 0 }
   0x6   :  { %15 = vsyncpa [#allocation4 + $0x1], 0  ;;  %s959_s15 = smov 0   ;;  %s961_s16 = smov 0  }
   0x7   :  { %s963_s17 = smov 0   ;;  %s965_s18 = smov 0  }
   0x8 LB: > { %s1242_s1 = sld [smem:[#allocation11_spill]]  ;;  %s983_s22 = sadd.s32 4294967295, %s927_s18   ;;  %s927_s18 = sphi %s965_s18, %s1252_s18   ;;  %s923_s17 = sphi %s963_s17, %s1251_s17   ;;  %s919_s16 = sphi %s961_s16, %s1250_s16   ;;  %s915_s15 = sphi %s959_s15, %s1249_s15  }
   0x9   : > { %p717_p0 = scmp.ge.s32.totalorder %s927_s18, 1  ;;  %p42_p1 = scmp.eq.s32.totalorder %s983_s22, 0 }
   0xa   : > { %p141_p2 = scmp.lt.s32.totalorder %s927_s18, 3  ;;  %s929_s24 = smov [#allocation5]  }
   0xb   : > { %s154_s25 = sshll.u32 %s929_s24, 4  ;;  %s930_s26 = smov 128   ;;  %s155_s25 = int_to_ptr.vmem [resolvable:$true] %s154_s25 }
   0xc   : > { %p988_p3 = pnand %p717_p0, %p141_p2  ;;  %s931_s27 = smov 8  }
   0xd   : > { %s716_s28 = sadd.s32 4294967294, %s927_s18   ;;  %s999_s29 = sadd.s32 1, %s927_s18  }
   0xe   : > { %s152_s21 = sshll.u32 %s1242_s1, 4  ;;  %p739_p4 = pneg %p988_p3  ;;  %s153_s21 = int_to_ptr.hbm [resolvable:$true] %s152_s21 }
   0xf   : > { %s28_s30 = sadd.s32 1, %s923_s17  ;;  %s25_s5 = ssub.s32 %s927_s18, %s999_s29 }
  0x10   : > { %p740_p6 = pnand %p739_p4, %p42_p1  ;;  %p35_p7 = scmp.ne.s32.totalorder %s923_s17, %s919_s16 }
  0x11   : > { %p26_p8 = scmp.eq.s32.totalorder %s25_s5, 0  ;;  %p36_p9 = scmp.eq.s32.totalorder %s927_s18, 0 }
  0x12   : > { %742 = dma.hbm_to_vmem [thread:$0]  (!%p740_p6), %s153_s21, 12288, %s155_s25, [#allocation6], %s930_s26, %s930_s26, %s931_s27  }
  0x13   : > { %p41_p10 = scmp.ne.s32.totalorder %s919_s16, %s915_s15  ;;  %p128_p11 = scmp.eq.s32.totalorder %s983_s22, 1 }
  0x14   : > { %s1011_s6 = scalar_select %p26_p8, %s923_s17, %s28_s30  }
  0x15   : > { %p37_p12 = por %p36_p9, %p35_p7  ;;  %p1015_p13 = por %p42_p1, %p41_p10 }
  0x16   : > { %p1019_p0 = por %p128_p11, %p35_p7  ;;  %p134_p2 = scmp.eq.s32.totalorder %s716_s28, 1 }
  0x17   : > { %p752_p4 = scmp.lt.s32.totalorder %s927_s18, 2  ;;  %s174_s9 = sand.u32 1, %s923_s17  }
  0x18   : > { %p1025_p6 = por %p134_p2, %p41_p10  ;;  %s728_s11 = smul.u32 48, %s174_s9 }
  0x19   : > { %p1029_p8 = pnand %p752_p4, %p37_p12  ;;  %s729_s13 = smul.u32 48, %s927_s18 }
  0x1a   : > { %s178_s21 = scalar_lea.vmem [#allocation2], %s728_s11  ;;  %s175_s26 = scalar_lea.sflag [#allocation3], %s174_s9 }
  0x1b   : > { %s183_s20 = scalar_lea.hbm %s1236_s0, %s729_s13  ;;  %s187_s24 = sshll.u32 %s178_s21, 4  ;;  %s188_s24 = int_to_ptr.vmem [resolvable:$true] %s187_s24 }
  0x1c   : > { %s185_s25 = sshll.u32 %s183_s20, 4  ;;  %p831_p9 = pneg %p1029_p8  ;;  %s186_s25 = int_to_ptr.hbm [resolvable:$true] %s185_s25 }
  0x1d   : > { %s827_s27 = sshra.s32 %s186_s25, 4  ;;  %s834_s1 = scalar_lea.hbm %s1236_s0, 96  ;;  %s828_s27 = int_to_ptr.hbm [resolvable:$true] %s827_s27 }
  0x1e   : > { %s829_s28 = scalar_lea.hbm %s828_s27, 48  ;;  %p835_p12 = scmp.lt.s32.totalorder %s828_s27, %s1236_s0 }
  0x1f   : > { %p830_p7 = scmp.ne.s32.totalorder %s828_s27, %s829_s28  ;;  %p836_p2 = scmp.lt.s32.totalorder %s834_s1, %s829_s28 }
  0x21   : > { %p832_p10 = pnand %p831_p9, %p830_p7  ;;  %p837_p4 = por %p836_p2, %p835_p12 }
  0x23   : > { %p833_p11 = pneg %p832_p10 }
  0x25   : > { %p838_p5 = pnand %p837_p4, %p833_p11 }
  0x27   : > { %841 = shalt.err (!%p838_p5)
}
  0x28   : > { %746 = dma.hbm_to_vmem [thread:$0]  (!%p1029_p8), %s186_s25, 768, %s188_s24, %s175_s26  }
  0x29   : > { %196 = sbr.rel (%p988_p3) target bundleno = 434 (0x1b2), region = 36  ;;  %s1050_s9 = sand.u32 (!%p988_p3), 1, %s919_s16  }
  0x2a   : > { %s730_s11 = smul.u32 (!%p988_p3), 48, %s1050_s9  ;;  %s199_s19 = scalar_lea.sflag (!%p988_p3), [#allocation3], %s1050_s9 }
  0x2c   : > { %s1054_s20 = scalar_lea.vmem (!%p988_p3), [#allocation2], %s730_s11 }
  0x2e   : > { %902 = dma.done.wait (%p1015_p13), %s199_s19, 768  }
  0x2f   : > { %904 = vsyncadd (%p1015_p13), %s199_s19, 4294966528 }
  0x30   : > { %906 = dma.done.wait (%p42_p1), [#allocation6], 12288  }
  0x31   : > { %908 = vsyncadd (%p42_p1), [#allocation6], 4294955008  ;;  %v254_v0 = vld [vmem:[#allocation5 + $0x78] sm:$0xff]  ;;  %v253_v2 = vld [vmem:[#allocation5 + $0x70] sm:$0xff]  ;;  %s723_s7 = sshll.u32 %s1050_s9, 3  ;;  %s725_s12 = sshll.u32 %s983_s22, 3 }
  0x32   : > { %v286_v1 = vld [vmem:[#allocation5 + $0x178] sm:$0xff]  ;;  %335 = vmatpush.msra.mxu0 %v254_v0  ;;  %v285_v4 = vld [vmem:[#allocation5 + $0x170] sm:$0xff]  ;;  %v252_v6 = vld [vmem:[#allocation5 + $0x68] sm:$0xff]  ;;  %s631_s25 = scalar_lea.hbm %s1240_s4, %s725_s12  ;;  %s232_s28 = scalar_lea.vmem [#allocation7], %s723_s7 }
  0x33   : > { %375 = vmatpush.msra.mxu2 %v286_v1  ;;  %v270_v3 = vld [vmem:[#allocation5 + $0xf8] sm:$0xff]  ;;  %v269_v7 = vld [vmem:[#allocation5 + $0xf0] sm:$0xff]  ;;  %v284_v8 = vld [vmem:[#allocation5 + $0x168] sm:$0xff]  ;;  %s633_s30 = sshll.u32 %s232_s28, 4  ;;  %s635_s5 = sshll.u32 %s631_s25, 4  ;;  %s634_s30 = int_to_ptr.vmem [resolvable:$true] %s633_s30  ;;  %s636_s5 = int_to_ptr.hbm [resolvable:$true] %s635_s5 }
  0x34   : > { %v302_v5 = vld [vmem:[#allocation5 + $0x1f8] sm:$0xff]  ;;  %355 = vmatpush.msra.mxu1 %v270_v3  ;;  %336 = vmatpush.msra.mxu0 %v253_v2  ;;  %v301_v9 = vld [vmem:[#allocation5 + $0x1f0] sm:$0xff]  ;;  %v268_v10 = vld [vmem:[#allocation5 + $0xe8] sm:$0xff]  ;;  %v932_v3 = vmov 1.0   ;;  %s621_s22 = scalar_lea.sflag [#allocation4], %s1050_s9  ;;  %s871_s14 = sshra.s32 %s636_s5, 4  ;;  %s872_s14 = int_to_ptr.hbm [resolvable:$true] %s871_s14 }
  0x35   : > { %395 = vmatpush.msra.mxu3 %v302_v5  ;;  %376 = vmatpush.msra.mxu2 %v285_v4  ;;  %v251_v11 = vld [vmem:[#allocation5 + $0x60] sm:$0xff]  ;;  %v300_v13 = vld [vmem:[#allocation5 + $0x1e8] sm:$0xff]  ;;  %v250_v16 = vld [vmem:[#allocation5 + $0x58] sm:$0xff]  ;;  %s873_s13 = scalar_lea.hbm %s872_s14, 8  ;;  %p878_p13 = scmp.lt.s32.totalorder %s872_s14, %s1240_s4 }
  0x36   : > { %356 = vmatpush.msra.mxu1 %v269_v7  ;;  %v283_v12 = vld [vmem:[#allocation5 + $0x160] sm:$0xff]  ;;  %337 = vmatpush.msra.mxu0 %v252_v6  ;;  %v282_v17 = vld [vmem:[#allocation5 + $0x158] sm:$0xff]  ;;  %v249_v20 = vld [vmem:[#allocation5 + $0x50] sm:$0xff]  ;;  %p874_p1 = scmp.ne.s32.totalorder %s872_s14, %s873_s13 }
  0x37   : > { %396 = vmatpush.msra.mxu3 %v301_v9  ;;  %377 = vmatpush.msra.mxu2 %v284_v8  ;;  %v267_v14 = vld [vmem:[#allocation5 + $0xe0] sm:$0xff]  ;;  %v266_v18 = vld [vmem:[#allocation5 + $0xd8] sm:$0xff]  ;;  %v281_v21 = vld [vmem:[#allocation5 + $0x150] sm:$0xff] }
  0x38   : > { %v299_v15 = vld [vmem:[#allocation5 + $0x1e0] sm:$0xff]  ;;  %357 = vmatpush.msra.mxu1 %v268_v10  ;;  %338 = vmatpush.msra.mxu0 %v251_v11  ;;  %v298_v19 = vld [vmem:[#allocation5 + $0x1d8] sm:$0xff]  ;;  %v265_v22 = vld [vmem:[#allocation5 + $0xd0] sm:$0xff]  ;;  %p875_p3 = pnand %p874_p1, %p1019_p0 }
  0x39   : > { %397 = vmatpush.msra.mxu3 %v300_v13  ;;  %378 = vmatpush.msra.mxu2 %v283_v12  ;;  %v297_v23 = vld [vmem:[#allocation5 + $0x1d0] sm:$0xff]  ;;  %v248_v24 = vld [vmem:[#allocation5 + $0x48] sm:$0xff]  ;;  %v247_v28 = vld [vmem:[#allocation5 + $0x40] sm:$0xff] }
  0x3a   : > { %358 = vmatpush.msra.mxu1 %v267_v14  ;;  %339 = vmatpush.msra.mxu0 %v250_v16  ;;  %v280_v25 = vld [vmem:[#allocation5 + $0x148] sm:$0xff]  ;;  %v279_v29 = vld [vmem:[#allocation5 + $0x140] sm:$0xff]  ;;  %v246_v32 = vld [vmem:[#allocation5 + $0x38] sm:$0xff]  ;;  %p876_p5 = pneg %p875_p3 }
  0x3b   : > { %398 = vmatpush.msra.mxu3 %v299_v15  ;;  %379 = vmatpush.msra.mxu2 %v282_v17  ;;  %v264_v26 = vld [vmem:[#allocation5 + $0xc8] sm:$0xff]  ;;  %v263_v30 = vld [vmem:[#allocation5 + $0xc0] sm:$0xff]  ;;  %v278_v33 = vld [vmem:[#allocation5 + $0x138] sm:$0xff] }
  0x3c   : > { %359 = vmatpush.msra.mxu1 %v266_v18  ;;  %340 = vmatpush.msra.mxu0 %v249_v20  ;;  %v296_v27 = vld [vmem:[#allocation5 + $0x1c8] sm:$0xff]  ;;  %v295_v31 = vld [vmem:[#allocation5 + $0x1c0] sm:$0xff]  ;;  %v262_v34 = vld [vmem:[#allocation5 + $0xb8] sm:$0xff] }
  0x3d   : > { %399 = vmatpush.msra.mxu3 %v298_v19  ;;  %380 = vmatpush.msra.mxu2 %v281_v21  ;;  %v294_v35 = vld [vmem:[#allocation5 + $0x1b8] sm:$0xff]  ;;  %v245_v36 = vld [vmem:[#allocation5 + $0x30] sm:$0xff]  ;;  %v244_v40 = vld [vmem:[#allocation5 + $0x28] sm:$0xff] }
  0x3e   : > { %360 = vmatpush.msra.mxu1 %v265_v22  ;;  %341 = vmatpush.msra.mxu0 %v248_v24  ;;  %v277_v37 = vld [vmem:[#allocation5 + $0x130] sm:$0xff]  ;;  %v276_v41 = vld [vmem:[#allocation5 + $0x128] sm:$0xff]  ;;  %v243_v44 = vld [vmem:[#allocation5 + $0x20] sm:$0xff] }
  0x3f   : > { %400 = vmatpush.msra.mxu3 %v297_v23  ;;  %381 = vmatpush.msra.mxu2 %v280_v25  ;;  %v261_v38 = vld [vmem:[#allocation5 + $0xb0] sm:$0xff]  ;;  %v260_v42 = vld [vmem:[#allocation5 + $0xa8] sm:$0xff]  ;;  %v275_v45 = vld [vmem:[#allocation5 + $0x120] sm:$0xff] }
  0x40   : > { %361 = vmatpush.msra.mxu1 %v264_v26  ;;  %342 = vmatpush.msra.mxu0 %v247_v28  ;;  %v293_v39 = vld [vmem:[#allocation5 + $0x1b0] sm:$0xff]  ;;  %v292_v43 = vld [vmem:[#allocation5 + $0x1a8] sm:$0xff]  ;;  %v259_v46 = vld [vmem:[#allocation5 + $0xa0] sm:$0xff] }
  0x41   : > { %401 = vmatpush.msra.mxu3 %v296_v27  ;;  %382 = vmatpush.msra.mxu2 %v279_v29  ;;  %v291_v47 = vld [vmem:[#allocation5 + $0x1a0] sm:$0xff]  ;;  %v242_v48 = vld [vmem:[#allocation5 + $0x18] sm:$0xff]  ;;  %v241_v52 = vld [vmem:[#allocation5 + $0x10] sm:$0xff] }
  0x42   : > { %362 = vmatpush.msra.mxu1 %v263_v30  ;;  %343 = vmatpush.msra.mxu0 %v246_v32  ;;  %v274_v49 = vld [vmem:[#allocation5 + $0x118] sm:$0xff]  ;;  %v273_v53 = vld [vmem:[#allocation5 + $0x110] sm:$0xff]  ;;  %v240_v56 = vld [vmem:[#allocation5 + $0x8] sm:$0xff] }
  0x43   : > { %402 = vmatpush.msra.mxu3 %v295_v31  ;;  %383 = vmatpush.msra.mxu2 %v278_v33  ;;  %v258_v50 = vld [vmem:[#allocation5 + $0x98] sm:$0xff]  ;;  %v257_v54 = vld [vmem:[#allocation5 + $0x90] sm:$0xff]  ;;  %v272_v57 = vld [vmem:[#allocation5 + $0x108] sm:$0xff] }
  0x44   : > { %363 = vmatpush.msra.mxu1 %v262_v34  ;;  %344 = vmatpush.msra.mxu0 %v245_v36  ;;  %v290_v51 = vld [vmem:[#allocation5 + $0x198] sm:$0xff]  ;;  %v289_v55 = vld [vmem:[#allocation5 + $0x190] sm:$0xff]  ;;  %v256_v58 = vld [vmem:[#allocation5 + $0x88] sm:$0xff] }
  0x45   : > { %403 = vmatpush.msra.mxu3 %v294_v35  ;;  %384 = vmatpush.msra.mxu2 %v277_v37  ;;  %v288_v59 = vld [vmem:[#allocation5 + $0x188] sm:$0xff]  ;;  %v239_v60 = vld [vmem:[#allocation5] sm:$0xff]  ;;  %v318_v62 = vld [vmem:[#allocation5 + $0x278] sm:$0xff] }
  0x46   : > { %364 = vmatpush.msra.mxu1 %v261_v38  ;;  %345 = vmatpush.msra.mxu0 %v244_v40  ;;  %v271_v61 = vld [vmem:[#allocation5 + $0x100] sm:$0xff]  ;;  %v317_v1 = vld [vmem:[#allocation5 + $0x270] sm:$0xff]  ;;  %v334_v2 = vld [vmem:[#allocation5 + $0x2f8] sm:$0xff] }
  0x47   : > { %404 = vmatpush.msra.mxu3 %v293_v39  ;;  %385 = vmatpush.msra.mxu2 %v276_v41  ;;  %v255_v63 = vld [vmem:[#allocation5 + $0x80] sm:$0xff]  ;;  %v316_v4 = vld [vmem:[#allocation5 + $0x268] sm:$0xff]  ;;  %v333_v5 = vld [vmem:[#allocation5 + $0x2f0] sm:$0xff] }
  0x48   : > { %365 = vmatpush.msra.mxu1 %v260_v42  ;;  %346 = vmatpush.msra.mxu0 %v243_v44  ;;  %v287_v0 = vld [vmem:[#allocation5 + $0x180] sm:$0xff]  ;;  %v332_v7 = vld [vmem:[#allocation5 + $0x2e8] sm:$0xff]  ;;  %v314_v8 = vld [vmem:[#allocation5 + $0x258] sm:$0xff] }
  0x49   : > { %405 = vmatpush.msra.mxu3 %v292_v43  ;;  %386 = vmatpush.msra.mxu2 %v275_v45  ;;  %v315_v6 = vld [vmem:[#allocation5 + $0x260] sm:$0xff]  ;;  %v313_v10 = vld [vmem:[#allocation5 + $0x250] sm:$0xff]  ;;  %v330_v11 = vld [vmem:[#allocation5 + $0x2d8] sm:$0xff]  ;;  %v933_v45 = vmov 0  }
  0x4a   : > { %366 = vmatpush.msra.mxu1 %v259_v46  ;;  %347 = vmatpush.msra.mxu0 %v242_v48  ;;  %v331_v9 = vld [vmem:[#allocation5 + $0x2e0] sm:$0xff]  ;;  %v312_v12 = vld [vmem:[#allocation5 + $0x248] sm:$0xff]  ;;  %v329_v13 = vld [vmem:[#allocation5 + $0x2d0] sm:$0xff] }
  0x4b   : > { %406 = vmatpush.msra.mxu3 %v291_v47  ;;  %387 = vmatpush.msra.mxu2 %v274_v49  ;;  %v311_v14 = vld [vmem:[#allocation5 + $0x240] sm:$0xff]  ;;  %v328_v15 = vld [vmem:[#allocation5 + $0x2c8] sm:$0xff]  ;;  %v310_v16 = vld [vmem:[#allocation5 + $0x238] sm:$0xff] }
  0x4c   : > { %367 = vmatpush.msra.mxu1 %v258_v50  ;;  %348 = vmatpush.msra.mxu0 %v241_v52  ;;  %v327_v17 = vld [vmem:[#allocation5 + $0x2c0] sm:$0xff]  ;;  %v309_v18 = vld [vmem:[#allocation5 + $0x230] sm:$0xff]  ;;  %v326_v19 = vld [vmem:[#allocation5 + $0x2b8] sm:$0xff] }
  0x4d   : > { %407 = vmatpush.msra.mxu3 %v290_v51  ;;  %388 = vmatpush.msra.mxu2 %v273_v53  ;;  %v308_v20 = vld [vmem:[#allocation5 + $0x228] sm:$0xff]  ;;  %v325_v21 = vld [vmem:[#allocation5 + $0x2b0] sm:$0xff]  ;;  %v307_v23 = vld [vmem:[#allocation5 + $0x220] sm:$0xff] }
  0x4e   : > { %368 = vmatpush.msra.mxu1 %v257_v54  ;;  %349 = vmatpush.msra.mxu0 %v240_v56  ;;  %v1084_v22 = vld [vmem:[%s1054_s20 + $0x10] sm:$0xff]  ;;  %v324_v24 = vld [vmem:[#allocation5 + $0x2a8] sm:$0xff]  ;;  %v1089_v25 = vld [vmem:[%s1054_s20] sm:$0xff] }
  0x4f   : > { %408 = vmatpush.msra.mxu3 %v289_v55  ;;  %389 = vmatpush.msra.mxu2 %v272_v57  ;;  %v1093_v26 = vld [vmem:[%s1054_s20 + $0x18] sm:$0xff]  ;;  %v323_v28 = vld [vmem:[#allocation5 + $0x2a0] sm:$0xff]  ;;  %v1099_v29 = vld [vmem:[%s1054_s20 + $0x8] sm:$0xff]  ;;  %v456_v39 = vmul.f32 %v1089_v25, %v1089_v25  ;;  %v458_v41 = vmul.f32 %v1084_v22, %v1084_v22 }
  0x50   : > { %369 = vmatpush.msra.mxu1 %v256_v58  ;;  %350 = vmatpush.msra.mxu0 %v239_v60  ;;  %v306_v27 = vld [vmem:[#allocation5 + $0x218] sm:$0xff]  ;;  %v305_v30 = vld [vmem:[#allocation5 + $0x210] sm:$0xff]  ;;  %v304_v32 = vld [vmem:[#allocation5 + $0x208] sm:$0xff]  ;;  %v457_v40 = vmul.f32 %v1099_v29, %v1099_v29  ;;  %v459_v43 = vmul.f32 %v1093_v26, %v1093_v26 }
  0x51   : > { %409 = vmatpush.msra.mxu3 %v288_v59  ;;  %390 = vmatpush.msra.mxu2 %v271_v61  ;;  %v322_v31 = vld [vmem:[#allocation5 + $0x298] sm:$0xff]  ;;  %v321_v33 = vld [vmem:[#allocation5 + $0x290] sm:$0xff]  ;;  %v303_v34 = vld [vmem:[#allocation5 + $0x200] sm:$0xff] }
  0x52   : > { %415 = vmatpush.msrb.mxu0 %v318_v62  ;;  %370 = vmatpush.msra.mxu1 %v255_v63  ;;  %v320_v35 = vld [vmem:[#allocation5 + $0x288] sm:$0xff]  ;;  %v1110_v36 = vld [vmem:[%s1054_s20 + $0x20] sm:$0xff] }
  0x53   : > { %462 = vmatpush.msrb.mxu2 %v932_v3  ;;  %410 = vmatpush.msra.mxu3 %v287_v0  ;;  %v319_v37 = vld [vmem:[#allocation5 + $0x280] sm:$0xff]  ;;  %v1115_v38 = vld [vmem:[%s1054_s20 + $0x28] sm:$0xff]  ;;  %v460_v42 = vmul.f32 %v1110_v36, %v1110_v36  ;;  %s877_s20 = scalar_lea.hbm %s1240_s4, 16 }
  0x54   : > { %416 = vmatpush.msrb.mxu0 %v317_v1  ;;  %435 = vmatpush.msrb.mxu1 %v334_v2  ;;  %v461_v44 = vmul.f32 %v1115_v38, %v1115_v38  ;;  %p879_p8 = scmp.lt.s32.totalorder %s877_s20, %s873_s13 }
  0x55   : > { %463 = vmatpush.msrb.mxu2 %v932_v3  ;;  %482 = vmatpush.msrb.mxu3 %v932_v3 }
  0x56   : > { %417 = vmatpush.msrb.mxu0 %v316_v4  ;;  %436 = vmatpush.msrb.mxu1 %v333_v5  ;;  %p880_p7 = por %p879_p8, %p878_p13 }
  0x57   : > { %464 = vmatpush.msrb.mxu2 %v932_v3  ;;  %483 = vmatpush.msrb.mxu3 %v932_v3 }
  0x58   : > { %418 = vmatpush.msrb.mxu0 %v315_v6  ;;  %437 = vmatpush.msrb.mxu1 %v332_v7  ;;  %p881_p9 = pnand %p880_p7, %p876_p5 }
  0x59   : > { %465 = vmatpush.msrb.mxu2 %v932_v3  ;;  %484 = vmatpush.msrb.mxu3 %v932_v3 }
  0x5a   : > { %419 = vmatpush.msrb.mxu0 %v314_v8  ;;  %438 = vmatpush.msrb.mxu1 %v331_v9 }
  0x5b   : > { %466 = vmatpush.msrb.mxu2 %v932_v3  ;;  %485 = vmatpush.msrb.mxu3 %v932_v3 }
  0x5c   : > { %420 = vmatpush.msrb.mxu0 %v313_v10  ;;  %439 = vmatpush.msrb.mxu1 %v330_v11 }
  0x5d   : > { %467 = vmatpush.msrb.mxu2 %v932_v3  ;;  %486 = vmatpush.msrb.mxu3 %v932_v3 }
  0x5e   : > { %421 = vmatpush.msrb.mxu0 %v312_v12  ;;  %440 = vmatpush.msrb.mxu1 %v329_v13 }
  0x5f   : > { %468 = vmatpush.msrb.mxu2 %v932_v3  ;;  %487 = vmatpush.msrb.mxu3 %v932_v3 }
  0x60   : > { %422 = vmatpush.msrb.mxu0 %v311_v14  ;;  %441 = vmatpush.msrb.mxu1 %v328_v15 }
  0x61   : > { %469 = vmatpush.msrb.mxu2 %v932_v3  ;;  %488 = vmatpush.msrb.mxu3 %v932_v3 }
  0x62   : > { %423 = vmatpush.msrb.mxu0 %v310_v16  ;;  %442 = vmatpush.msrb.mxu1 %v327_v17  ;;  %v793_v17 = vld [vmem:[%s1238_s2] ss:$0 sm:$0xff] }
  0x63   : > { %470 = vmatpush.msrb.mxu2 %v932_v3  ;;  %489 = vmatpush.msrb.mxu3 %v932_v3 }
  0x64   : > { %424 = vmatpush.msrb.mxu0 %v309_v18  ;;  %443 = vmatpush.msrb.mxu1 %v326_v19 }
  0x65   : > { %471 = vmatpush.msrb.mxu2 %v932_v3  ;;  %490 = vmatpush.msrb.mxu3 %v932_v3 }
  0x66   : > { %425 = vmatpush.msrb.mxu0 %v308_v20  ;;  %444 = vmatpush.msrb.mxu1 %v325_v21  ;;  %v794_v21 = vld [vmem:[%s1239_s3] ss:$0 sm:$0xff] }
  0x67   : > { %472 = vmatpush.msrb.mxu2 %v932_v3  ;;  %491 = vmatpush.msrb.mxu3 %v932_v3 }
  0x68   : > { %391 = vmatmul.f32.vlgmr.msra.gmra.mxu2 %v1084_v22  ;;  %426 = vmatpush.msrb.mxu0 %v307_v23 }
  0x69   : > { %445 = vmatpush.msrb.mxu1 %v324_v24  ;;  %473 = vmatpush.msrb.mxu2 %v932_v3 }
  0x6a   : > { %492 = vmatpush.msrb.mxu3 %v932_v3  ;;  %351 = vmatmul.f32.vlgmr.msra.gmra.mxu0 %v1089_v25 }
  0x6b   : > { %411 = vmatmul.f32.vlgmr.msra.gmra.mxu3 %v1093_v26  ;;  %427 = vmatpush.msrb.mxu0 %v306_v27 }
  0x6c   : > { %446 = vmatpush.msrb.mxu1 %v323_v28  ;;  %474 = vmatpush.msrb.mxu2 %v932_v3 }
  0x6d   : > { %493 = vmatpush.msrb.mxu3 %v932_v3  ;;  %371 = vmatmul.f32.vlgmr.msra.gmra.mxu1 %v1099_v29 }
  0x6e   : > { %428 = vmatpush.msrb.mxu0 %v305_v30  ;;  %447 = vmatpush.msrb.mxu1 %v322_v31 }
  0x6f   : > { %475 = vmatpush.msrb.mxu2 %v932_v3  ;;  %494 = vmatpush.msrb.mxu3 %v932_v3 }
  0x70   : > { %429 = vmatpush.msrb.mxu0 %v304_v32  ;;  %448 = vmatpush.msrb.mxu1 %v321_v33 }
  0x71   : > { %476 = vmatpush.msrb.mxu2 %v932_v3  ;;  %495 = vmatpush.msrb.mxu3 %v932_v3 }
  0x72   : > { %430 = vmatpush.msrb.mxu0 %v303_v34  ;;  %449 = vmatpush.msrb.mxu1 %v320_v35 }
  0x73   : > { %477 = vmatpush.msrb.mxu2 %v932_v3  ;;  %496 = vmatpush.msrb.mxu3 %v932_v3 }
  0x74   : > { %431 = vmatmul.f32.vlgmr.msrb.gmra.mxu0 %v1110_v36  ;;  %450 = vmatpush.msrb.mxu1 %v319_v37 }
  0x75   : > { %542 = vmatpush.msra.mxu2 %v932_v3  ;;  %502 = vmatpush.msra.mxu0 %v932_v3 }
  0x76   : > { %497 = vmatpush.msrb.mxu3 %v932_v3  ;;  %451 = vmatmul.f32.vlgmr.msrb.gmra.mxu1 %v1115_v38 }
  0x77   : > { %503 = vmatpush.msra.mxu0 %v932_v3  ;;  %522 = vmatpush.msra.mxu1 %v932_v3 }
  0x78   : > { %543 = vmatpush.msra.mxu2 %v932_v3  ;;  %562 = vmatpush.msra.mxu3 %v932_v3 }
  0x79   : > { %504 = vmatpush.msra.mxu0 %v932_v3  ;;  %523 = vmatpush.msra.mxu1 %v932_v3 }
  0x7a   : > { %544 = vmatpush.msra.mxu2 %v932_v3  ;;  %563 = vmatpush.msra.mxu3 %v932_v3 }
  0x7b   : > { %505 = vmatpush.msra.mxu0 %v932_v3  ;;  %524 = vmatpush.msra.mxu1 %v932_v3 }
  0x7c   : > { %545 = vmatpush.msra.mxu2 %v932_v3  ;;  %564 = vmatpush.msra.mxu3 %v932_v3 }
  0x7d   : > { %506 = vmatpush.msra.mxu0 %v932_v3  ;;  %525 = vmatpush.msra.mxu1 %v932_v3 }
  0x7e   : > { %546 = vmatpush.msra.mxu2 %v932_v3  ;;  %565 = vmatpush.msra.mxu3 %v932_v3 }
  0x7f   : > { %507 = vmatpush.msra.mxu0 %v932_v3  ;;  %526 = vmatpush.msra.mxu1 %v932_v3 }
  0x80   : > { %547 = vmatpush.msra.mxu2 %v932_v3  ;;  %566 = vmatpush.msra.mxu3 %v932_v3 }
  0x81   : > { %508 = vmatpush.msra.mxu0 %v932_v3  ;;  %527 = vmatpush.msra.mxu1 %v932_v3 }
  0x82   : > { %548 = vmatpush.msra.mxu2 %v932_v3  ;;  %567 = vmatpush.msra.mxu3 %v932_v3 }
  0x83   : > { %509 = vmatpush.msra.mxu0 %v932_v3  ;;  %528 = vmatpush.msra.mxu1 %v932_v3 }
  0x84   : > { %549 = vmatpush.msra.mxu2 %v932_v3  ;;  %568 = vmatpush.msra.mxu3 %v932_v3 }
  0x85   : > { %510 = vmatpush.msra.mxu0 %v932_v3  ;;  %529 = vmatpush.msra.mxu1 %v932_v3 }
  0x86   : > { %550 = vmatpush.msra.mxu2 %v932_v3  ;;  %569 = vmatpush.msra.mxu3 %v932_v3 }
  0x87   : > { %511 = vmatpush.msra.mxu0 %v932_v3  ;;  %530 = vmatpush.msra.mxu1 %v932_v3 }
  0x88   : > { %551 = vmatpush.msra.mxu2 %v932_v3  ;;  %570 = vmatpush.msra.mxu3 %v932_v3 }
  0x89   : > { %512 = vmatpush.msra.mxu0 %v932_v3  ;;  %531 = vmatpush.msra.mxu1 %v932_v3 }
  0x8a   : > { %552 = vmatpush.msra.mxu2 %v932_v3  ;;  %571 = vmatpush.msra.mxu3 %v932_v3 }
  0x8b   : > { %513 = vmatpush.msra.mxu0 %v932_v3  ;;  %532 = vmatpush.msra.mxu1 %v932_v3 }
  0x8c   : > { %553 = vmatpush.msra.mxu2 %v932_v3  ;;  %572 = vmatpush.msra.mxu3 %v932_v3 }
  0x8d   : > { %478 = vmatmul.f32.vlgmr.msrb.gmra.mxu2 %v456_v39  ;;  %498 = vmatmul.f32.vlgmr.msrb.gmra.mxu3 %v457_v40 }
  0x8e   : > { %514 = vmatpush.msra.mxu0 %v932_v3  ;;  %533 = vmatpush.msra.mxu1 %v932_v3 }
  0x8f   : > { %554 = vmatpush.msra.mxu2 %v932_v3  ;;  %573 = vmatpush.msra.mxu3 %v932_v3 }
  0x90   : > { %515 = vmatpush.msra.mxu0 %v932_v3  ;;  %534 = vmatpush.msra.mxu1 %v932_v3 }
  0x91   : > { %555 = vmatpush.msra.mxu2 %v932_v3  ;;  %574 = vmatpush.msra.mxu3 %v932_v3 }
  0x92   : > { %516 = vmatpush.msra.mxu0 %v932_v3  ;;  %535 = vmatpush.msra.mxu1 %v932_v3 }
  0x93   : > { %556 = vmatpush.msra.mxu2 %v932_v3  ;;  %575 = vmatpush.msra.mxu3 %v932_v3 }
  0x94   : > { %517 = vmatpush.msra.mxu0 %v932_v3  ;;  %536 = vmatpush.msra.mxu1 %v932_v3 }
  0x95   : > { %557 = vmatpush.msra.mxu2 %v932_v3  ;;  %576 = vmatpush.msra.mxu3 %v932_v3 }
  0x96   : > { %518 = vmatmul.f32.vlgmr.msra.gmra.mxu0 %v458_v41  ;;  %558 = vmatmul.f32.vlgmr.msra.gmra.mxu2 %v460_v42 }
  0x97   : > { %537 = vmatpush.msra.mxu1 %v932_v3  ;;  %577 = vmatpush.msra.mxu3 %v932_v3 }
  0x98   : > { %538 = vmatmul.f32.vlgmr.msra.gmra.mxu1 %v459_v43  ;;  %578 = vmatmul.f32.vlgmr.msra.gmra.mxu3 %v461_v44 }
  0x99   : > { %792 = vset.pattern.permute.xlu0 %v933_v45 }
  0xe7   : > { %v352_v46 = vpop.f32.mrf.mxu0 }
  0xea   : > { %v372_v47 = vpop.f32.mrf.mxu1 }
  0xeb   : > { %v373_v48 = vadd.f32 %v372_v47, %v352_v46  ;;  %v392_v49 = vpop.f32.mrf.mxu2 }
  0xed   : > { %v393_v50 = vadd.f32 %v392_v49, %v373_v48 }
  0xee   : > { %v412_v51 = vpop.f32.mrf.mxu3 }
  0xef   : > { %v413_v52 = vadd.f32 %v412_v51, %v393_v50 }
  0xf1   : > { %v432_v53 = vpop.f32.mrf.mxu0 }
  0xf2   : > { %v433_v54 = vadd.f32 %v432_v53, %v413_v52 }
  0xf3   : > { %v452_v55 = vpop.f32.mrf.mxu1 }
  0xf4   : > { %v453_v56 = vadd.f32 %v452_v55, %v433_v54 }
  0xf6   : > { %v455_v57 = vmul.f32 0.0013020834, %v453_v56 }
  0xf8   : > { %600 = vperm.xlu0 %792, %v455_v57   ;;  %v583_v5 = vmul.f32 %v455_v57, %v455_v57 }
 0x110   : > { %v479_v58 = vpop.f32.mrf.mxu2  ;;  %v499_v59 = vpop.f32.mrf.mxu3 }
 0x111   : > { %v500_v60 = vadd.f32 %v499_v59, %v479_v58 }
 0x113   : > { %v519_v61 = vpop.f32.mrf.mxu0 }
 0x114   : > { %v520_v62 = vadd.f32 %v519_v61, %v500_v60 }
 0x115   : > { %v539_v63 = vpop.f32.mrf.mxu1 }
 0x116   : > { %v540_v0 = vadd.f32 %v539_v63, %v520_v62 }
 0x119   : > { %v559_v1 = vpop.f32.mrf.mxu2 }
 0x11a   : > { %v560_v2 = vadd.f32 %v559_v1, %v540_v0 }
 0x11b   : > { %v579_v3 = vpop.f32.mrf.mxu3 }
 0x11c   : > { %v580_v4 = vadd.f32 %v579_v3, %v560_v2 }
 0x11e   : > { %v582_v6 = vmul.f32 0.0013020834, %v580_v4 }
 0x120   : > { %v584_v7 = vsub.f32 %v582_v6, %v583_v5 }
 0x122   : > { %v585_v8 = vmax.f32 %v584_v7, 0.0 }
 0x124   : > { %v586_v9 = vadd.f32 1e-06, %v585_v8 }
 0x126   : > { %795 = vrsqrt.f32 %v586_v9  ;;  %vm593_vm1 = vweird.f32 %v586_v9 }
 0x12c   : > { %v796_v10 = vpop.eup %795 }
 0x12d   : > { %v588_v11 = vmul.f32 %v796_v10, %v586_v9  ;;  %vm594_vm0 = vweird.f32 %v796_v10 }
 0x12e   : > { %vm595_vm2 = vmor %vm593_vm1, %vm594_vm0 }
 0x12f   : > { %v589_v12 = vmul.f32 %v796_v10, %v588_v11 }
 0x131   : > { %v590_v13 = vmul.f32 0.5, %v589_v12 }
 0x133   : > { %v591_v14 = vsub.f32 1.5, %v590_v13 }
 0x135   : > { %v592_v15 = vmul.f32 %v796_v10, %v591_v14 }
 0x137   : > { %v596_v16 = vsel %vm595_vm2, %v796_v10, %v592_v15 }
 0x138   : > { %610 = vperm.xlu0 %792, %v596_v16  }
 0x16a   : > { %v601_v18 = vpop.permute.xlu0 %600 }
 0x16b   : > { %v606_v19 = vmul.f32 %v793_v17, %v601_v18 }
 0x16d   : > { %v607_v20 = vsub.f32 %v453_v56, %v606_v19 }
 0x1aa   : > { %v611_v22 = vpop.permute.xlu0 %610 }
 0x1ab   : > { %v613_v23 = vmul.f32 %v611_v22, %v607_v20 }
 0x1ad   : > { %v618_v24 = vadd.f32 %v794_v21, %v613_v23 }
 0x1af   : > { %619 = vst [vmem:[%s232_s28] sm:$0xff] %v618_v24 }
 0x1b0   : > { %884 = shalt.err (!%p881_p9)
}
 0x1b1   : > { %737 = dma.vmem_to_hbm [thread:$0]  (%p1019_p0), %s634_s30, 128, %s636_s5, %s621_s22  }
 0x1b2 PF: > { %s647_s9 = sand.u32 1, %s915_s15   ;;  %p1248_p10 = scmp.ge.s32.totalorder %s927_s18, 2 }
 0x1b3   : > { %s648_s7 = scalar_lea.sflag [#allocation4], %s647_s9 }
 0x1b4   : > { %p748_p11 = pnand %p1248_p10, %p1025_p6 }
 0x1b6   : > { %p749_p12 = pneg %p748_p11 }
 0x1b8   : > { %910 = dma.done.wait (%p749_p12), %s648_s7, 128  }
 0x1b9   : > { %912 = vsyncadd (%p749_p12), %s648_s7, 4294967168  ;;  %p18_p2 = scmp.ge.s32.totalorder %s999_s29, 4   ;;  %s1249_s15 = smov %s919_s16 }
 0x1ba   : > { %s1250_s16 = smov %s923_s17  ;;  %s1251_s17 = smov %s1011_s6 }
 0x1bb   : > { %s1252_s18 = smov %s999_s29  ;;  %20 = sbr.rel (!%p18_p2) target bundleno = 8 (0x8), region = 85 }
 0x1c0   :  { %654 = vsyncpa [#allocation3], 1 }
 0x1c1   :  { %656 = vsyncpa [#allocation3 + $0x1], 1 }
 0x1c2   :  { %657 = vsyncpa [#allocation6], 1 }
 0x1c3   :  { %658 = vsyncpa [#allocation4], 1 }
 0x1c4   :  { %660 = vsyncpa [#allocation4 + $0x1], 1 }

</bundles_post_ra>
